<compile_context>
chip_gen: v7x
topology: tpu7x:2x2x1
jax: 0.10.0
libtpu: 0.0.40
codegen_flags: <defaults>
</compile_context>

<pallas_src>
import jax
import jax.numpy as jnp
from jax.experimental import pallas as pl
from jax.experimental.pallas import tpu as pltpu


def _memory_kernel(q_ref, keys_t_ref, w2_ref, bias_ref, out_ref):
    # q: (N, D); keys_t: (D, 2M); w2: (2M, TAIL) = [blockdiag(em, sm) | W_fused | 0];
    # bias: (1, TAIL) = [0 | 0 | gate_bias | 0]; out: (N, 2M + TAIL).
    m2 = keys_t_ref.shape[1]       # 2M
    m = m2 // 2

    # One fused score matmul for both memory banks (keys pre-transposed and
    # concatenated host-side, once, at parameter-prep time).
    scores = jnp.dot(q_ref[...], keys_t_ref[...],
                     preferred_element_type=jnp.float32)          # (N, 2M)

    def _softmax(s):
        mx = jnp.max(s, axis=-1, keepdims=True)
        e = jnp.exp(s - mx)
        # exact reciprocal: keeps tight agreement with the f32 reference
        return e * pl.reciprocal(jnp.sum(e, axis=-1, keepdims=True),
                                 approx=False)

    # M is a multiple of 128, so these lane slices stay on vreg boundaries.
    ew = _softmax(scores[:, :m])                                  # (N, M)
    sw = _softmax(scores[:, m:])                                  # (N, M)
    w_all = jnp.concatenate([ew, sw], axis=-1)                    # (N, 2M)

    # Single fused output matmul:
    #   w2 = [[em, 0, em @ Wg[:D], 0],
    #         [0, sm, sm @ Wg[D:], 0]]          (2M, TAIL)
    # so tail = [ec | sc | combined(no bias) | 0]; bias is pre-padded.
    tail = jnp.dot(w_all, w2_ref[...],
                   preferred_element_type=jnp.float32) + bias_ref[...]

    # Both stores are 128-lane aligned -> unmasked full-width vst.
    out_ref[:, :m2] = w_all
    out_ref[:, m2:] = tail


def prepare_memory_params(episodic_keys, episodic_memory,
                          semantic_keys, semantic_memory,
                          gate_weight, gate_bias):
    """Fold all loop-invariant parameter transforms once (at init / after each
    parameter update), so the per-call forward launches straight into the
    kernel with no wrapper-side transpose / concat / gate-fusion ops.

    gate_weight: (D, 2D) nn.Linear layout (y = x @ W.T + b). gate_bias: (D,).
    """
    M, D = episodic_keys.shape
    tail = ((3 * D + 127) // 128) * 128          # lane-dense tail width
    pad = tail - 3 * D

    # (D, 2M): both key banks, pre-transposed for the fused scores matmul.
    keys_t = jnp.concatenate([episodic_keys, semantic_keys], axis=0).T

    wg_t = gate_weight.T                          # (2D, D)
    # Gate folded into the memory banks: combined = [ew|sw] @ W_fused + b.
    w_fused = jnp.concatenate([episodic_memory @ wg_t[:D],
                               semantic_memory @ wg_t[D:]], axis=0)   # (2M, D)
    # Block-diagonal bank matrix so [ec|sc] = [ew|sw] @ blockdiag(em, sm).
    bank_bd = jnp.zeros((2 * M, 2 * D), jnp.float32)
    bank_bd = bank_bd.at[:M, :D].set(episodic_memory)
    bank_bd = bank_bd.at[M:, D:].set(semantic_memory)

    w2 = jnp.concatenate(
        [bank_bd, w_fused, jnp.zeros((2 * M, pad), jnp.float32)], axis=1)  # (2M, TAIL)
    bias_pad = jnp.zeros((1, tail), jnp.float32).at[:, 2 * D:3 * D].set(gate_bias)
    return keys_t, w2, bias_pad


def real_memory_forward(query, keys_t, w2, bias_pad):
    """query: (B, S, D); keys_t/w2/bias_pad from prepare_memory_params."""
    B, S, D = query.shape
    M2 = keys_t.shape[1]
    M = M2 // 2
    TAIL = w2.shape[1]
    N = B * S

    assert M % 128 == 0, "memory_size must be a multiple of 128 (lane-aligned splits)"
    assert N % 8 == 0, "B*S must be a multiple of 8 (sublane alignment)"

    q2 = query.reshape(N, D)

    def full(shape):
        return pl.BlockSpec(shape, lambda i: (0,) * len(shape))

    slab = pl.pallas_call(
        _memory_kernel,
        out_shape=jax.ShapeDtypeStruct((N, M2 + TAIL), jnp.float32),
        grid_spec=pltpu.PrefetchScalarGridSpec(
            num_scalar_prefetch=0,
            grid=(1,),                    # toy shapes: single invocation
            in_specs=[
                full((N, D)),             # query (B*S, D)
                full((D, M2)),            # [episodic_keys; semantic_keys]^T
                full((2 * M, TAIL)),      # fused bank + gate weights
                full((1, TAIL)),          # padded gate bias
            ],
            out_specs=full((N, M2 + TAIL)),
        ),
        compiler_params=pltpu.CompilerParams(
            dimension_semantics=("arbitrary",)),
    )(q2, keys_t, w2, bias_pad)

    # Host-side unpacking of the lane-dense slab.
    ew = slab[:, :M].reshape(B, S, M)
    sw = slab[:, M:M2].reshape(B, S, M)
    ec = slab[:, M2:M2 + D].reshape(B, S, D)
    sc = slab[:, M2 + D:M2 + 2 * D].reshape(B, S, D)
    comb = slab[:, M2 + 2 * D:M2 + 3 * D].reshape(B, S, D)

    memory_state = {
        "episodic_weights": ew,
        "semantic_weights": sw,
        "episodic_content": ec,
        "semantic_content": sc,
        "combined_memory": comb,
    }
    return comb, memory_state


def _reference_forward(query, ek, em, sk, sm, gate_weight, gate_bias):
    es = jnp.einsum("bsd,md->bsm", query, ek)
    ew = jax.nn.softmax(es, axis=-1)
    ec = jnp.einsum("bsm,md->bsd", ew, em)
    ss = jnp.einsum("bsd,md->bsm", query, sk)
    sw = jax.nn.softmax(ss, axis=-1)
    sc = jnp.einsum("bsm,md->bsd", sw, sm)
    combined = jnp.concatenate([ec, sc], axis=-1) @ gate_weight.T + gate_bias
    return combined, ew, sw, ec, sc


if __name__ == "__main__":
    B, S, D, M = 2, 8, 32, 128   # batch, seq, d_model, memory_size

    key = jax.random.PRNGKey(0)
    k = jax.random.split(key, 7)
    query = jax.random.normal(k[0], (B, S, D), dtype=jnp.float32)
    episodic_memory = jax.random.normal(k[1], (M, D), dtype=jnp.float32)
    episodic_keys   = jax.random.normal(k[2], (M, D), dtype=jnp.float32)
    semantic_memory = jax.random.normal(k[3], (M, D), dtype=jnp.float32)
    semantic_keys   = jax.random.normal(k[4], (M, D), dtype=jnp.float32)
    # nn.Linear(2D, D): weight (D, 2D), bias (D,).
    bound = 1.0 / jnp.sqrt(2.0 * D)
    gate_weight = jax.random.uniform(k[5], (D, 2 * D), jnp.float32,
                                     minval=-bound, maxval=bound)
    gate_bias = jax.random.uniform(k[6], (D,), jnp.float32,
                                   minval=-bound, maxval=bound)

    # Loop-invariant parameter prep (done once, not per forward call).
    keys_t, w2, bias_pad = prepare_memory_params(
        episodic_keys, episodic_memory, semantic_keys, semantic_memory,
        gate_weight, gate_bias)

    combined, state = real_memory_forward(query, keys_t, w2, bias_pad)
    jax.block_until_ready(combined)

    ref_comb, ref_ew, ref_sw, ref_ec, ref_sc = _reference_forward(
        query, episodic_keys, episodic_memory,
        semantic_keys, semantic_memory, gate_weight, gate_bias)

    assert jnp.allclose(combined, ref_comb, atol=1e-4, rtol=1e-4)
    assert jnp.allclose(state["episodic_weights"], ref_ew, atol=1e-5, rtol=1e-4)
    assert jnp.allclose(state["semantic_weights"], ref_sw, atol=1e-5, rtol=1e-4)
    assert jnp.allclose(state["episodic_content"], ref_ec, atol=1e-4, rtol=1e-4)
    assert jnp.allclose(state["semantic_content"], ref_sc, atol=1e-4, rtol=1e-4)
    assert jnp.allclose(state["combined_memory"], ref_comb, atol=1e-4, rtol=1e-4)

    print("KERNEL_OK")
</pallas_src>

<mosaic_0001>
module attributes {stable_mosaic.version = 11 : i64} {
  func.func @_memory_kernel(%arg0: i32, %arg1: memref<16x32xf32, #tpu.memory_space<vmem>>, %arg2: memref<32x256xf32, #tpu.memory_space<vmem>>, %arg3: memref<256x128xf32, #tpu.memory_space<vmem>>, %arg4: memref<1x128xf32, #tpu.memory_space<vmem>>, %arg5: memref<16x384xf32, #tpu.memory_space<vmem>>) attributes {dimension_semantics = [#tpu.dimension_semantics<arbitrary>], iteration_bounds = array<i64: 1>, scalar_prefetch = 0 : i64, scratch_operands = 0 : i64, tpu.core_type = #tpu.core_type<tc>, window_params = [{pipeline_mode = #tpu.pipeline_mode<synchronous>, transform_indices = @transform_0, window_bounds = array<i64: 16, 32>}, {pipeline_mode = #tpu.pipeline_mode<synchronous>, transform_indices = @transform_1, window_bounds = array<i64: 32, 256>}, {pipeline_mode = #tpu.pipeline_mode<synchronous>, transform_indices = @transform_2, window_bounds = array<i64: 256, 128>}, {pipeline_mode = #tpu.pipeline_mode<synchronous>, transform_indices = @transform_3, window_bounds = array<i64: 1, 128>}, {pipeline_mode = #tpu.pipeline_mode<synchronous>, transform_indices = @transform_4, window_bounds = array<i64: 16, 384>}]} {
    %c0 = arith.constant 0 : index
    %c0_0 = arith.constant 0 : index
    %0 = vector.load %arg1[%c0, %c0_0] : memref<16x32xf32, #tpu.memory_space<vmem>>, vector<16x32xf32>
    %c0_1 = arith.constant 0 : index
    %c0_2 = arith.constant 0 : index
    %1 = vector.load %arg2[%c0_1, %c0_2] : memref<32x256xf32, #tpu.memory_space<vmem>>, vector<32x256xf32>
    %cst = arith.constant dense<0.000000e+00> : vector<16x256xf32>
    %2 = tpu.matmul %0, %1, %cst {dimension_numbers = #tpu.dot_dimension_numbers<[1], [0], [0], [1], [0, 0, 1, 1], [], []>} : vector<16x32xf32>, vector<32x256xf32>, vector<16x256xf32> -> vector<16x256xf32>
    %3 = vector.extract_strided_slice %2 {offsets = [0, 0], sizes = [16, 128], strides = [1, 1]} : vector<16x256xf32> to vector<16x128xf32>
    %cst_3 = arith.constant dense<0xFF800000> : vector<16xf32>
    %4 = vector.multi_reduction <maximumf>, %3, %cst_3 [1] : vector<16x128xf32> to vector<16xf32>
    %5 = vector.shape_cast %4 : vector<16xf32> to vector<16x1xf32>
    %6 = vector.broadcast %5 : vector<16x1xf32> to vector<16x128xf32>
    %7 = arith.subf %3, %6 : vector<16x128xf32>
    %8 = math.exp %7 : vector<16x128xf32>
    %cst_4 = arith.constant dense<0.000000e+00> : vector<16xf32>
    %9 = vector.multi_reduction <add>, %8, %cst_4 [1] : vector<16x128xf32> to vector<16xf32>
    %10 = vector.shape_cast %9 : vector<16xf32> to vector<16x1xf32>
    %11 = tpu.reciprocal %10 : vector<16x1xf32> -> vector<16x1xf32>
    %12 = vector.broadcast %11 : vector<16x1xf32> to vector<16x128xf32>
    %13 = arith.mulf %8, %12 : vector<16x128xf32>
    %14 = vector.extract_strided_slice %2 {offsets = [0, 128], sizes = [16, 128], strides = [1, 1]} : vector<16x256xf32> to vector<16x128xf32>
    %cst_5 = arith.constant dense<0xFF800000> : vector<16xf32>
    %15 = vector.multi_reduction <maximumf>, %14, %cst_5 [1] : vector<16x128xf32> to vector<16xf32>
    %16 = vector.shape_cast %15 : vector<16xf32> to vector<16x1xf32>
    %17 = vector.broadcast %16 : vector<16x1xf32> to vector<16x128xf32>
    %18 = arith.subf %14, %17 : vector<16x128xf32>
    %19 = math.exp %18 : vector<16x128xf32>
    %cst_6 = arith.constant dense<0.000000e+00> : vector<16xf32>
    %20 = vector.multi_reduction <add>, %19, %cst_6 [1] : vector<16x128xf32> to vector<16xf32>
    %21 = vector.shape_cast %20 : vector<16xf32> to vector<16x1xf32>
    %22 = tpu.reciprocal %21 : vector<16x1xf32> -> vector<16x1xf32>
    %23 = vector.broadcast %22 : vector<16x1xf32> to vector<16x128xf32>
    %24 = arith.mulf %19, %23 : vector<16x128xf32>
    %25 = tpu.concatenate %13, %24 in 1 : vector<16x128xf32>, vector<16x128xf32> -> vector<16x256xf32>
    %c0_7 = arith.constant 0 : index
    %c0_8 = arith.constant 0 : index
    %26 = vector.load %arg3[%c0_7, %c0_8] : memref<256x128xf32, #tpu.memory_space<vmem>>, vector<256x128xf32>
    %cst_9 = arith.constant dense<0.000000e+00> : vector<16x128xf32>
    %27 = tpu.matmul %25, %26, %cst_9 {dimension_numbers = #tpu.dot_dimension_numbers<[1], [0], [0], [1], [0, 0, 1, 1], [], []>} : vector<16x256xf32>, vector<256x128xf32>, vector<16x128xf32> -> vector<16x128xf32>
    %c0_10 = arith.constant 0 : index
    %c0_11 = arith.constant 0 : index
    %28 = vector.load %arg4[%c0_10, %c0_11] : memref<1x128xf32, #tpu.memory_space<vmem>>, vector<1x128xf32>
    %29 = vector.broadcast %28 : vector<1x128xf32> to vector<16x128xf32>
    %30 = arith.addf %27, %29 : vector<16x128xf32>
    %c0_12 = arith.constant 0 : index
    %c0_13 = arith.constant 0 : index
    %31 = vector.load %arg5[%c0_12, %c0_13] : memref<16x384xf32, #tpu.memory_space<vmem>>, vector<16x256xf32>
    tpu.vector_store %arg5[%c0_12, %c0_13], %25 {strides = array<i32>} : memref<16x384xf32, #tpu.memory_space<vmem>>, vector<16x256xf32>,
    %c0_14 = arith.constant 0 : index
    %c256 = arith.constant 256 : index
    %32 = vector.load %arg5[%c0_14, %c256] : memref<16x384xf32, #tpu.memory_space<vmem>>, vector<16x128xf32>
    tpu.vector_store %arg5[%c0_14, %c256], %30 {strides = array<i32>} : memref<16x384xf32, #tpu.memory_space<vmem>>, vector<16x128xf32>,
    return
  }
  func.func @transform_0(%arg0: i32) -> (i32, i32) {
    %c0_i32 = arith.constant 0 : i32
    %c0_i32_0 = arith.constant 0 : i32
    %c0_i32_1 = arith.constant 0 : i32
    return %c0_i32, %c0_i32_0 : i32, i32
  }
  func.func @transform_1(%arg0: i32) -> (i32, i32) {
    %c0_i32 = arith.constant 0 : i32
    %c0_i32_0 = arith.constant 0 : i32
    %c0_i32_1 = arith.constant 0 : i32
    return %c0_i32, %c0_i32_0 : i32, i32
  }
  func.func @transform_2(%arg0: i32) -> (i32, i32) {
    %c0_i32 = arith.constant 0 : i32
    %c0_i32_0 = arith.constant 0 : i32
    %c0_i32_1 = arith.constant 0 : i32
    return %c0_i32, %c0_i32_0 : i32, i32
  }
  func.func @transform_3(%arg0: i32) -> (i32, i32) {
    %c0_i32 = arith.constant 0 : i32
    %c0_i32_0 = arith.constant 0 : i32
    %c0_i32_1 = arith.constant 0 : i32
    return %c0_i32, %c0_i32_0 : i32, i32
  }
  func.func @transform_4(%arg0: i32) -> (i32, i32) {
    %c0_i32 = arith.constant 0 : i32
    %c0_i32_0 = arith.constant 0 : i32
    %c0_i32_1 = arith.constant 0 : i32
    return %c0_i32, %c0_i32_0 : i32, i32
  }
}

</mosaic_0001>

<bundles_post_ra>
// kernel: tpu_custom_call.1
= control target key start
LH: loop header
LB: loop body
LE: loop exit
PB: predicated region body
PF: predicated region fallthrough
CT: control target
= control target key end

     0   :  { %9 = vsyncpa [#allocation3], 0  ;;  %s616_s0 = inlined_call_operand.hbm [shape: f32[16,32], index: 0, kind: input, shape index: {}]   ;;  %s617_s1 = inlined_call_operand.hbm [shape: f32[32,256], index: 1, kind: input, shape index: {}]   ;;  %s618_s2 = inlined_call_operand.hbm [shape: f32[256,128], index: 2, kind: input, shape index: {}]   ;;  %s619_s3 = inlined_call_operand.vmem [shape: f32[1,128], index: 3, kind: input, shape index: {}]   ;;  %s620_s4 = inlined_call_operand.hbm [shape: f32[16,384], index: 4, kind: output, shape index: {}]  }
   0x1   :  { %10 = vsyncpa [#allocation6], 0 }
   0x2   :  { %11 = vsyncpa [#allocation4], 0  ;;  %s529_s15 = smov [#allocation5]   ;;  %s435_s19 = scalar_lea.hbm %s617_s1, 1024 }
   0x3   :  { %s29_s16 = sshll.u32 %s529_s15, 4  ;;  %p436_p0 = scmp.ne.s32.totalorder %s617_s1, %s435_s19  ;;  %s30_s16 = int_to_ptr.vmem [resolvable:$true] %s29_s16 }
   0x4   :  { %p439_p1 = scmp.lt.u32.totalorder %s435_s19, %s617_s1 }
   0x6   :  { %p441_p2 = pnand %p439_p1, %p436_p0 }
   0x8   :  { %444 = shalt.err (!%p441_p2)
}
   0x9   :  { %s445_s24 = scalar_lea.vmem %s30_s16, 1024  ;;  %p450_p4 = scmp.lt.s32.totalorder %s30_s16, %s30_s16 }
   0xa   :  { %p446_p3 = scmp.ne.s32.totalorder %s30_s16, %s445_s24  ;;  %p451_p5 = scmp.lt.s32.totalorder %s445_s24, %s445_s24 }
   0xc   :  { %p452_p6 = por %p451_p5, %p450_p4 }
   0xe   :  { %p453_p7 = pnand %p452_p6, %p446_p3 }
  0x10   :  { %456 = shalt.err (!%p453_p7)
}
  0x11   :  { %s530_s25 = smov 256   ;;  %s531_s26 = smov 16  }
  0x12   :  { %35 = dma.hbm_to_vmem [thread:$0]  %s617_s1, 1024, %s30_s16, [#allocation6], %s530_s25, %s530_s25, %s531_s26  }
  0x13   :  { %s532_s29 = smov [#allocation2]   ;;  %s457_s7 = scalar_lea.hbm %s616_s0, 256 }
  0x14   :  { %s17_s30 = sshll.u32 %s532_s29, 4  ;;  %p458_p8 = scmp.ne.s32.totalorder %s616_s0, %s457_s7  ;;  %s18_s30 = int_to_ptr.vmem [resolvable:$true] %s17_s30 }
  0x15   :  { %p461_p9 = scmp.lt.u32.totalorder %s457_s7, %s616_s0 }
  0x17   :  { %p463_p10 = pnand %p461_p9, %p458_p8 }
  0x19   :  { %466 = shalt.err (!%p463_p10)
}
  0x1a   :  { %s467_s12 = scalar_lea.vmem %s18_s30, 256  ;;  %p472_p12 = scmp.lt.s32.totalorder %s18_s30, %s18_s30 }
  0x1b   :  { %p468_p11 = scmp.ne.s32.totalorder %s18_s30, %s467_s12  ;;  %p473_p13 = scmp.lt.s32.totalorder %s467_s12, %s467_s12 }
  0x1d   :  { %p474_p0 = por %p473_p13, %p472_p12 }
  0x1f   :  { %p475_p1 = pnand %p474_p0, %p468_p11 }
  0x21   :  { %478 = shalt.err (!%p475_p1)
}
  0x22   :  { %s533_s1 = smov 128   ;;  %s534_s13 = smov 8  }
  0x23   :  { %23 = dma.hbm_to_vmem [thread:$0]  %s616_s0, 256, %s18_s30, [#allocation3], %s533_s1, %s533_s1, %s534_s13  }
  0x24   :  { %s535_s16 = smov [#allocation7]   ;;  %s479_s20 = scalar_lea.hbm %s618_s2, 4096 }
  0x25   :  { %s41_s17 = sshll.u32 %s535_s16, 4  ;;  %p480_p2 = scmp.ne.s32.totalorder %s618_s2, %s479_s20  ;;  %s42_s17 = int_to_ptr.vmem [resolvable:$true] %s41_s17 }
  0x26   :  { %p483_p3 = scmp.lt.u32.totalorder %s479_s20, %s618_s2 }
  0x28   :  { %p485_p4 = pnand %p483_p3, %p480_p2 }
  0x2a   :  { %488 = shalt.err (!%p485_p4)
}
  0x2b   :  { %s489_s25 = scalar_lea.vmem %s42_s17, 4096  ;;  %p494_p6 = scmp.lt.s32.totalorder %s42_s17, %s42_s17 }
  0x2c   :  { %p490_p5 = scmp.ne.s32.totalorder %s42_s17, %s489_s25  ;;  %p495_p7 = scmp.lt.s32.totalorder %s489_s25, %s489_s25 }
  0x2e   :  { %p496_p8 = por %p495_p7, %p494_p6 }
  0x30   :  { %p497_p9 = pnand %p496_p8, %p490_p5 }
  0x32   :  { %500 = shalt.err (!%p497_p9)
}
  0x33   :  { %47 = dma.hbm_to_vmem [thread:$0]  %s618_s2, 4096, %s42_s17, [#allocation6], %s533_s1, %s533_s1, %s534_s13  }
  0x34   :  { %523 = dma.done.wait [#allocation3], 256  }
  0x35   :  { %524 = vsyncadd [#allocation3], 4294967040 }
  0x36   :  { %525 = dma.done.wait [#allocation6], 5120  }
  0x37   :  { %526 = vsyncadd [#allocation6], 4294962176  ;;  %v536_v0 = vmov 0.0   ;;  %v62_v1 = vld [vmem:[#allocation5 + $0x8] sm:$0xff]  ;;  %v64_v2 = vld [vmem:[#allocation5 + $0x18] sm:$0xff]  ;;  %vm69_vm0 = vcmask 261120  }
  0x38   :  { %140 = vmatprep.mubr.f32.mxu0 %v536_v0  ;;  %v61_v3 = vld [vmem:[#allocation5] sm:$0xff]  ;;  %v368_v4 = vpack.c.bf16 %v64_v2, %v62_v1  ;;  %v63_v5 = vld [vmem:[#allocation5 + $0x10] sm:$0xff]  ;;  %v66_v6 = vld [vmem:[#allocation5 + $0x28] sm:$0xff]  ;;  %s537_s28 = smov [#allocation8]  }
  0x39   :  { %v68_v7 = vld [vmem:[#allocation5 + $0x38] sm:$0xff]  ;;  %v370_v8 = vpack.c.bf16 %v63_v5, %v61_v3  ;;  %v65_v10 = vld [vmem:[#allocation5 + $0x20] sm:$0xff]  ;;  %v67_v11 = vld [vmem:[#allocation5 + $0x30] sm:$0xff]  ;;  %s314_s29 = sshll.u32 %s537_s28, 4  ;;  %s315_s29 = int_to_ptr.vmem [resolvable:$true] %s314_s29 }
  0x3a   :  { %v372_v9 = vpack.c.bf16 %v68_v7, %v66_v6  ;;  %369 = vmatprep.subr.bf16.mxu0 %v368_v4  ;;  %v374_v12 = vpack.c.bf16 %v67_v11, %v65_v10  ;;  %v59_v13 = vld [vmem:[#allocation2] sm:$0xff]  ;;  %v60_v14 = vld [vmem:[#allocation2 + $0x8] sm:$0xff]  ;;  %v205_v19 = vld [vmem:[#allocation7 + $0x80] sm:$0xff]  ;;  %s501_s30 = scalar_lea.vmem %s315_s29, 768  ;;  %p506_p11 = scmp.lt.s32.totalorder %s315_s29, %s315_s29 }
  0x3b   :  { %371 = vmatpush1.bf16.msra.mxu0 %v370_v8  ;;  %v206_v20 = vld [vmem:[#allocation7 + $0x88] sm:$0xff]  ;;  %v189_v21 = vld [vmem:[#allocation7] sm:$0xff]  ;;  %v207_v24 = vld [vmem:[#allocation7 + $0x90] sm:$0xff]  ;;  %p502_p10 = scmp.ne.s32.totalorder %s315_s29, %s501_s30  ;;  %p507_p12 = scmp.lt.s32.totalorder %s501_s30, %s501_s30 }
  0x3c   :  { %373 = vmatprep.subr.bf16.mxu0 %v372_v9  ;;  %v376_v22 = vpack.c.bf16 %v206_v20, %v205_v19  ;;  %v190_v23 = vld [vmem:[#allocation7 + $0x8] sm:$0xff]  ;;  %v208_v25 = vld [vmem:[#allocation7 + $0x98] sm:$0xff]  ;;  %v191_v28 = vld [vmem:[#allocation7 + $0x10] sm:$0xff] }
  0x3d   :  { %v378_v26 = vpack.c.bf16 %v190_v23, %v189_v21  ;;  %v380_v27 = vpack.c.bf16 %v208_v25, %v207_v24  ;;  %v192_v29 = vld [vmem:[#allocation7 + $0x18] sm:$0xff]  ;;  %v209_v30 = vld [vmem:[#allocation7 + $0xa0] sm:$0xff]  ;;  %v210_v31 = vld [vmem:[#allocation7 + $0xa8] sm:$0xff]  ;;  %p508_p13 = por %p507_p12, %p506_p11 }
  0x3e   :  { %377 = vmatprep.subr.bf16.mxu1 %v376_v22  ;;  %v382_v32 = vpack.c.bf16 %v192_v29, %v191_v28  ;;  %v384_v33 = vpack.c.bf16 %v210_v31, %v209_v30  ;;  %v193_v34 = vld [vmem:[#allocation7 + $0x20] sm:$0xff]  ;;  %v194_v35 = vld [vmem:[#allocation7 + $0x28] sm:$0xff]  ;;  %v211_v36 = vld [vmem:[#allocation7 + $0xb0] sm:$0xff] }
  0x3f   :  { %375 = vmatpush1.bf16.msra.mxu0 %v374_v12  ;;  %379 = vmatpush3.bf16.msra.mxu1 %v378_v26  ;;  %v212_v37 = vld [vmem:[#allocation7 + $0xb8] sm:$0xff]  ;;  %v386_v38 = vpack.c.bf16 %v194_v35, %v193_v34  ;;  %v195_v40 = vld [vmem:[#allocation7 + $0x30] sm:$0xff]  ;;  %v213_v59 = vld [vmem:[#allocation7 + $0xc0] sm:$0xff]  ;;  %p509_p0 = pnand %p508_p13, %p502_p10 }
  0x40   :  { %381 = vmatprep.subr.bf16.mxu1 %v380_v27  ;;  %v388_v39 = vpack.c.bf16 %v212_v37, %v211_v36  ;;  %v196_v41 = vld [vmem:[#allocation7 + $0x38] sm:$0xff]  ;;  %v214_v60 = vld [vmem:[#allocation7 + $0xc8] sm:$0xff]  ;;  %v197_v62 = vld [vmem:[#allocation7 + $0x40] sm:$0xff] }
  0x41   :  { %v390_v42 = vpack.c.bf16 %v196_v41, %v195_v40  ;;  %v392_v61 = vpack.c.bf16 %v214_v60, %v213_v59  ;;  %v198_v63 = vld [vmem:[#allocation7 + $0x48] sm:$0xff]  ;;  %v215_v1 = vld [vmem:[#allocation7 + $0xd0] sm:$0xff]  ;;  %v216_v2 = vld [vmem:[#allocation7 + $0xd8] sm:$0xff] }
  0x42   :  { %327 = vmatmul.mubr.msk.f32.vlgmr.msra.gmra.mrb[0].mxu0 %vm69_vm0, %v59_v13  ;;  %v396_v3 = vpack.c.bf16 %v216_v2, %v215_v1  ;;  %v199_v4 = vld [vmem:[#allocation7 + $0x50] sm:$0xff]  ;;  %v200_v5 = vld [vmem:[#allocation7 + $0x58] sm:$0xff]  ;;  %v217_v7 = vld [vmem:[#allocation7 + $0xe0] sm:$0xff] }
  0x43   :  { %146 = vmatprep.mubr.f32.mxu0 %v536_v0  ;;  %383 = vmatpush3.bf16.msra.mxu1 %v382_v32  ;;  %v394_v0 = vpack.c.bf16 %v198_v63, %v197_v62  ;;  %v398_v6 = vpack.c.bf16 %v200_v5, %v199_v4  ;;  %v218_v8 = vld [vmem:[#allocation7 + $0xe8] sm:$0xff]  ;;  %v201_v10 = vld [vmem:[#allocation7 + $0x60] sm:$0xff]  ;;  %v219_v12 = vld [vmem:[#allocation7 + $0xf0] sm:$0xff] }
  0x44   :  { %385 = vmatprep.subr.bf16.mxu1 %v384_v33  ;;  %v400_v9 = vpack.c.bf16 %v218_v8, %v217_v7  ;;  %v202_v11 = vld [vmem:[#allocation7 + $0x68] sm:$0xff]  ;;  %v329_v32 = vld [vmem:[%s619_s3] ss:$0 sm:$0xff] }
  0x45   :  { %v402_v13 = vpack.c.bf16 %v202_v11, %v201_v10 }
  0x46   :  { %328 = vmatmul.mubr.msk.f32.gmra.mrb[2].mxu0 %vm69_vm0, %v60_v14  ;;  %v220_v14 = vld [vmem:[#allocation7 + $0xf8] sm:$0xff] }
  0x47   :  { %387 = vmatpush3.bf16.msra.mxu1 %v386_v38 }
  0x48   :  { %389 = vmatprep.subr.bf16.mxu1 %v388_v39 }
  0x4b   :  { %391 = vmatpush3.bf16.msra.mxu1 %v390_v42 }
  0x4c   :  { %393 = vmatprep.subr.bf16.mxu1 %v392_v61 }
  0x4f   :  { %395 = vmatpush3.bf16.msra.mxu1 %v394_v0 }
  0x50   :  { %397 = vmatprep.subr.bf16.mxu1 %v396_v3 }
  0x53   :  { %399 = vmatpush3.bf16.msra.mxu1 %v398_v6 }
  0x54   :  { %401 = vmatprep.subr.bf16.mxu1 %v400_v9 }
  0x57   :  { %403 = vmatpush3.bf16.msra.mxu1 %v402_v13 }
 0x115   :  { %v142_v15 = vpop.f32.mrb[0].mxu0 }
 0x116   :  { %v144_v16 = vpop.f32.mrb[1].mxu0 }
 0x117   :  { %171 = vmax.xlane.f32.xlu0 %v144_v16 }
 0x119   :  { %v148_v17 = vpop.f32.mrb[2].mxu0 }
 0x11a   :  { %v150_v18 = vpop.f32.mrb[3].mxu0 }
 0x11b   :  { %153 = vmax.xlane.f32.xlu0 %v142_v15  ;;  %173 = vmax.xlane.f32.xlu1 %v150_v18 }
 0x11f   :  { %155 = vmax.xlane.f32.xlu1 %v148_v17 }
 0x1a4   :  { %v172_v43 = vpop.xlane.xlu0 %171 }
 0x1a5   :  { %v175_v44 = vsub.f32 %v144_v16, %v172_v43  ;;  %v203_v16 = vld [vmem:[#allocation7 + $0x70] sm:$0xff] }
 0x1a7   :  { %v177_v45 = vmul.f32 1.442695, %v175_v44 }
 0x1a8   :  { %v154_v46 = vpop.xlane.xlu0 %153  ;;  %v174_v47 = vpop.xlane.xlu1 %173 }
 0x1a9   :  { %419 = vpow2.f32 %v177_v45  ;;  %v157_v48 = vsub.f32 %v142_v15, %v154_v46  ;;  %v176_v49 = vsub.f32 %v150_v18, %v174_v47  ;;  %v404_v15 = vpack.c.bf16 %v220_v14, %v219_v12 }
 0x1ab   :  { %v159_v50 = vmul.f32 1.442695, %v157_v48  ;;  %v179_v51 = vmul.f32 1.442695, %v176_v49  ;;  %405 = vmatprep.subr.bf16.mxu1 %v404_v15 }
 0x1ac   :  { %v156_v52 = vpop.xlane.xlu1 %155 }
 0x1ad   :  { %421 = vpow2.f32 %v159_v50  ;;  %v158_v53 = vsub.f32 %v148_v17, %v156_v52  ;;  %v204_v17 = vld [vmem:[#allocation7 + $0x78] sm:$0xff] }
 0x1ae   :  { %423 = vpow2.f32 %v179_v51  ;;  %v406_v18 = vpack.c.bf16 %v204_v17, %v203_v16 }
 0x1af   :  { %v161_v54 = vmul.f32 1.442695, %v158_v53 }
 0x1b0   :  { %407 = vmatpush3.bf16.msra.mxu1 %v406_v18 }
 0x1b1   :  { %425 = vpow2.f32 %v161_v54 }
 0x1b3   :  { %v420_v55 = vpop.eup %419 }
 0x1b4   :  { %181 = vadd.xlane.f32.xlu0 %v420_v55 }
 0x1b7   :  { %v422_v56 = vpop.eup %421 }
 0x1b8   :  { %v424_v57 = vpop.eup %423  ;;  %163 = vadd.xlane.f32.xlu1 %v422_v56 }
 0x1b9   :  { %183 = vadd.xlane.f32.xlu0 %v424_v57 }
 0x1bb   :  { %v426_v58 = vpop.eup %425 }
 0x1bc   :  { %165 = vadd.xlane.f32.xlu1 %v426_v58 }
 0x241   :  { %v182_v19 = vpop.xlane.xlu0 %181 }
 0x242   :  { %427 = vrcp.f32 %v182_v19 }
 0x245   :  { %v164_v20 = vpop.xlane.xlu1 %163 }
 0x246   :  { %v184_v21 = vpop.xlane.xlu0 %183  ;;  %429 = vrcp.f32 %v164_v20 }
 0x247   :  { %431 = vrcp.f32 %v184_v21 }
 0x249   :  { %v166_v22 = vpop.xlane.xlu1 %165 }
 0x24a   :  { %433 = vrcp.f32 %v166_v22 }
 0x24c   :  { %v428_v23 = vpop.eup %427 }
 0x24d   :  { %v187_v24 = vmul.f32 %v428_v23, %v420_v55 }
 0x24f   :  { %292 = vmatprep.mubr.f32.mxu1 %v187_v24  ;;  %304 = vst [vmem:[#allocation8 + $0x8] sm:$0xff] %v187_v24 }
 0x250   :  { %v430_v25 = vpop.eup %429 }
 0x251   :  { %v432_v26 = vpop.eup %431  ;;  %v169_v27 = vmul.f32 %v430_v25, %v422_v56 }
 0x252   :  { %v188_v28 = vmul.f32 %v432_v26, %v424_v57 }
 0x253   :  { %293 = vmatmul.mubr.f32.vlgmr.msra.gmra.mrb[0].mxu1 %v169_v27  ;;  %303 = vst [vmem:[#allocation8] sm:$0xff] %v169_v27 }
 0x254   :  { %v434_v29 = vpop.eup %433  ;;  %297 = vmatprep.mubr.f32.mxu1 %v188_v28  ;;  %306 = vst [vmem:[#allocation8 + $0x20] sm:$0xff] %v188_v28 }
 0x255   :  { %v170_v30 = vmul.f32 %v434_v29, %v426_v58 }
 0x257   :  { %298 = vmatmul.mubr.f32.gmra.mrb[2].mxu1 %v170_v30  ;;  %305 = vst [vmem:[#allocation8 + $0x18] sm:$0xff] %v170_v30 }
 0x326   :  { %v362_v31 = vpop.f32.mrb[0].mxu1 }
 0x327   :  { %v363_v33 = vpop.f32.mrb[1].mxu1 }
 0x328   :  { %v364_v34 = vadd.f32 %v363_v33, %v362_v31 }
 0x32a   :  { %v295_v35 = vadd.f32 %v364_v34, %v329_v32  ;;  %v365_v36 = vpop.f32.mrb[2].mxu1 }
 0x32b   :  { %v366_v37 = vpop.f32.mrb[3].mxu1 }
 0x32c   :  { %307 = vst [vmem:[#allocation8 + $0x10] sm:$0xff] %v295_v35  ;;  %v367_v38 = vadd.f32 %v366_v37, %v365_v36 }
 0x32e   :  { %v300_v39 = vadd.f32 %v367_v38, %v329_v32 }
 0x330   :  { %308 = vst [vmem:[#allocation8 + $0x28] sm:$0xff] %v300_v39 }
 0x331   :  { %512 = shalt.err (!%p509_p0)
}
 0x332   :  { %s513_s6 = scalar_lea.hbm %s620_s4, 768 }
 0x333   :  { %p514_p1 = scmp.ne.s32.totalorder %s620_s4, %s513_s6  ;;  %p517_p2 = scmp.lt.u32.totalorder %s513_s6, %s620_s4 }
 0x335   :  { %p519_p3 = pnand %p517_p2, %p514_p1 }
 0x337   :  { %522 = shalt.err (!%p519_p3)
}
 0x338   :  { %s538_s11 = smov 384   ;;  %s539_s12 = smov 24  }
 0x339   :  { %320 = dma.vmem_to_hbm [thread:$0]  %s315_s29, 768, %s620_s4, [#allocation4], %s538_s11, %s538_s11, %s539_s12  }
 0x33a   :  { %527 = dma.done.wait [#allocation4], 768  }
 0x33b   :  { %528 = vsyncadd [#allocation4], 4294966528 }
 0x33c   :  { %324 = vsyncpa [#allocation3], 1 }
 0x33d   :  { %325 = vsyncpa [#allocation6], 1 }
 0x33e   :  { %326 = vsyncpa [#allocation4], 1 }

</bundles_post_ra>
